<compile_context>
chip_gen: v5e
topology: v5e:2x2
jax: 0.10.0
libtpu: 0.0.40
codegen_flags: <defaults>
</compile_context>

<pallas_src>
import jax
import jax.numpy as jnp
from jax.experimental import pallas as pl
from jax.experimental.pallas import tpu as pltpu


def _rel_scores_kernel(x_ref, w_ref, u_ref, out_ref):
    """Per-relation scores: sigmoid(u_r . tanh(q W_r q^T + V_r q + b_r)) for all r.

    Shapes (D = embed dim, S = slice_dim, R = num_rels, M = R*S, K = pad(D*D+D+1)):
      x_ref   : (1, K)   [vec(q⊗q), q, 1, zero-pad]
      w_ref   : (K, M)   [Wflat; Vᵀ; vb; zero-pad]   (augmented weight, contraction-major)
      u_ref   : (M, R)   Ut[r*S+s, r'] = u[r, s] * delta(r, r')
      out_ref : (1, R)   per-relation sigmoid scores
    """
    h = jnp.tanh(jnp.dot(x_ref[...], w_ref[...],
                         preferred_element_type=jnp.float32))      # (1, M)
    raw = jnp.dot(h, u_ref[...], preferred_element_type=jnp.float32)  # (1, R)
    out_ref[...] = jax.nn.sigmoid(raw)


def make_factorized_posterior_scorer(w_all, v_all, vb_all, u_all):
    """One-time parameter packing.  Returns a jitted fn(node_embeds, rel_ids).

    w_all : (R, S, D, D)  nn.Bilinear weights (bias=False)
    v_all : (R, S, D)     nn.Linear(D, S) weights
    vb_all: (R, S)        nn.Linear(D, S) biases
    u_all : (R, S)        nn.Linear(S, 1, bias=False) weights
    """
    f32 = jnp.float32
    r, s, d, _ = w_all.shape
    m = r * s
    k_raw = d * d + d + 1                       # vec(q⊗q) + q + bias-one
    k_pad = ((k_raw + 127) // 128) * 128        # lane-aligned contraction depth

    # ---- constant re-layouts, executed ONCE at parameter-load time ----
    # Wflat[d*D+k, r*S+s] = W[r, s, d, k]
    wflat = jnp.transpose(w_all.astype(f32), (2, 3, 0, 1)).reshape(d * d, m)
    vt = jnp.transpose(v_all.astype(f32).reshape(m, d))            # (D, M)
    vb_row = vb_all.astype(f32).reshape(1, m)                      # (1, M)
    w_aug = jnp.concatenate(
        [wflat, vt, vb_row, jnp.zeros((k_pad - k_raw, m), f32)], axis=0)   # (K, M)
    # Ut[r*S+s, r'] = u[r, s] * delta(r, r')
    ut = (u_all.astype(f32)[:, :, None]
          * jnp.eye(r, dtype=f32)[:, None, :]).reshape(m, r)       # (M, R)
    w_aug = jax.device_put(w_aug)
    ut = jax.device_put(ut)

    vmem = pl.BlockSpec(memory_space=pltpu.MemorySpace.VMEM)
    rel_score_call = pl.pallas_call(
        _rel_scores_kernel,
        out_shape=jax.ShapeDtypeStruct((1, r), jnp.float32),
        in_specs=[vmem, vmem, vmem],
        out_specs=vmem,
    )

    @jax.jit
    def score(node_embeds, rel_ids):
        q = node_embeds.astype(f32)                                # (D,)
        qq = (q[:, None] * q[None, :]).reshape(d * d)              # vec(q⊗q)
        x = jnp.concatenate(
            [qq, q, jnp.ones((1,), f32), jnp.zeros((k_pad - k_raw,), f32)]
        ).reshape(1, k_pad)                                        # (1, K)
        rel_scores = rel_score_call(x, w_aug, ut)[0]               # (R,)
        per_sample = rel_scores[rel_ids]                           # gather per scored sample
        return per_sample, jnp.max(per_sample)                     # == torch.max(one_rule_score)

    return score


def reference_forward(node_embeds, rel_ids, w_all, v_all, vb_all, u_all):
    """Pure-JAX reference mirroring the PyTorch eval branch."""
    q = node_embeds.astype(jnp.float32)
    outs = []
    for ridx in list(rel_ids):
        rr = int(ridx)
        bil = jnp.einsum('d,sdk,k->s', q, w_all[rr], q)          # nn.Bilinear (no bias)
        lin = v_all[rr] @ q + vb_all[rr]                         # nn.Linear(D, S)
        raw = jnp.dot(u_all[rr], jnp.tanh(bil + lin))            # nn.Linear(S, 1, no bias)
        outs.append(jax.nn.sigmoid(raw))
    scores = jnp.stack(outs)
    return scores, jnp.max(scores)


if __name__ == "__main__":
    latent_dim = 32
    slice_dim = 5
    num_rels = 4
    num_args = 1  # TODO(synk): PRED_DICT / per-relation num_args is external metadata; assume 1 arg.
    D = num_args * latent_dim

    # Synthetic in-script replacement for the JSON/txt-derived rel2idx table.
    rel_names = [f"rel{i}" for i in range(num_rels)]
    rel2idx = {name: i for i, name in enumerate(rel_names)}

    key = jax.random.PRNGKey(0)
    kW, kV, kb, ku, kq = jax.random.split(key, 5)
    w_all = 0.1 * jax.random.normal(kW, (num_rels, slice_dim, D, D), jnp.float32)   # Bilinear weights
    v_all = 0.1 * jax.random.normal(kV, (num_rels, slice_dim, D), jnp.float32)      # Linear weights
    vb_all = 0.1 * jax.random.normal(kb, (num_rels, slice_dim), jnp.float32)        # Linear biases
    u_all = 0.1 * jax.random.normal(ku, (num_rels, slice_dim), jnp.float32)         # u_R weights
    node_embeds = jax.random.normal(kq, (D,), jnp.float32)

    # Eval-path latent_vars: samples[0] is a list of (pred_name, sample); only the
    # first len-1 entries are scored, matching the PyTorch `range(len(samples[0]) - 1)`.
    samples0 = [("rel1", 0), ("rel3", 1), ("rel0", 2), ("rel2", 3), ("rel1", 4), ("rel3", 5)]
    rel_ids = jnp.array([rel2idx[name] for name, _ in samples0[:-1]], dtype=jnp.int32)

    # One-time parameter packing (hoisted constant re-layouts) + jitted forward.
    scorer = make_factorized_posterior_scorer(w_all, v_all, vb_all, u_all)

    per_sample, pre_rulebody = scorer(node_embeds, rel_ids)
    jax.block_until_ready((per_sample, pre_rulebody))

    ref_scores, ref_max = reference_forward(node_embeds, rel_ids, w_all, v_all, vb_all, u_all)
    assert jnp.allclose(per_sample, ref_scores, rtol=1e-4, atol=1e-4), (per_sample, ref_scores)
    assert jnp.allclose(pre_rulebody, ref_max, rtol=1e-4, atol=1e-4), (pre_rulebody, ref_max)

    # TODO(synk): the training branch's mask bookkeeping (pos/neg/latent mask products and the
    # running torch.max "potential") is plain elementwise glue around this same score kernel.
    print("KERNEL_OK")
</pallas_src>

<mosaic_0001>
module attributes {stable_mosaic.version = 11 : i64} {
  func.func @_rel_scores_kernel(%arg0: memref<1x1152xf32, #tpu.memory_space<vmem>>, %arg1: memref<1152x20xf32, #tpu.memory_space<vmem>>, %arg2: memref<20x4xf32, #tpu.memory_space<vmem>>, %arg3: memref<1x4xf32, #tpu.memory_space<vmem>>) attributes {dimension_semantics = [], scalar_prefetch = 0 : i64, scratch_operands = 0 : i64, tpu.core_type = #tpu.core_type<tc>} {
    %c0 = arith.constant 0 : index
    %c0_0 = arith.constant 0 : index
    %0 = vector.load %arg0[%c0, %c0_0] : memref<1x1152xf32, #tpu.memory_space<vmem>>, vector<1x1152xf32>
    %c0_1 = arith.constant 0 : index
    %c0_2 = arith.constant 0 : index
    %1 = vector.load %arg1[%c0_1, %c0_2] : memref<1152x20xf32, #tpu.memory_space<vmem>>, vector<1152x20xf32>
    %cst = arith.constant dense<0.000000e+00> : vector<1x20xf32>
    %2 = tpu.matmul %0, %1, %cst {dimension_numbers = #tpu.dot_dimension_numbers<[1], [0], [0], [1], [0, 0, 1, 1], [], []>} : vector<1x1152xf32>, vector<1152x20xf32>, vector<1x20xf32> -> vector<1x20xf32>
    %3 = math.tanh %2 : vector<1x20xf32>
    %c0_3 = arith.constant 0 : index
    %c0_4 = arith.constant 0 : index
    %4 = vector.load %arg2[%c0_3, %c0_4] : memref<20x4xf32, #tpu.memory_space<vmem>>, vector<20x4xf32>
    %cst_5 = arith.constant dense<0.000000e+00> : vector<1x4xf32>
    %5 = tpu.matmul %3, %4, %cst_5 {dimension_numbers = #tpu.dot_dimension_numbers<[1], [0], [0], [1], [0, 0, 1, 1], [], []>} : vector<1x20xf32>, vector<20x4xf32>, vector<1x4xf32> -> vector<1x4xf32>
    %6 = arith.negf %5 : vector<1x4xf32>
    %7 = math.exp %6 : vector<1x4xf32>
    %cst_6 = arith.constant 1.000000e+00 : f32
    %8 = vector.broadcast %cst_6 : f32 to vector<1x4xf32>
    %9 = arith.addf %8, %7 : vector<1x4xf32>
    %10 = arith.divf %8, %9 : vector<1x4xf32>
    %c0_7 = arith.constant 0 : index
    %c0_8 = arith.constant 0 : index
    %11 = vector.load %arg3[%c0_7, %c0_8] : memref<1x4xf32, #tpu.memory_space<vmem>>, vector<1x4xf32>
    tpu.vector_store %arg3[%c0_7, %c0_8], %10 {strides = array<i32>} : memref<1x4xf32, #tpu.memory_space<vmem>>, vector<1x4xf32>,
    return
  }
}

</mosaic_0001>

<bundles_post_ra>
// kernel: score.1
= control target key start
LH: loop header
LB: loop body
LE: loop exit
PB: predicated region body
PF: predicated region fallthrough
CT: control target
= control target key end

     0   :  { %8 = vsyncpa [#allocation3], 0  ;;  %s473_s15 = smov [#allocation2]   ;;  %s474_s17 = smov 128   ;;  %s527_s0 = inlined_call_operand.vmem [shape: f32[1,1152], index: 0, kind: input, shape index: {}]   ;;  %s528_s1 = inlined_call_operand.hbm [shape: f32[1152,20], index: 1, kind: input, shape index: {}]   ;;  %s529_s2 = inlined_call_operand.vmem [shape: f32[20,4], index: 2, kind: input, shape index: {}]   ;;  %s530_s3 = inlined_call_operand.vmem [shape: f32[1,4], index: 3, kind: output, shape index: {}]  }
   0x1   :  { %s15_s14 = sshll.u32 %s528_s1, 4  ;;  %s17_s16 = sshll.u32 %s473_s15, 4  ;;  %s16_s14 = int_to_ptr.hbm [resolvable:$true] %s15_s14  ;;  %s18_s16 = int_to_ptr.vmem [resolvable:$true] %s17_s16 }
   0x2   :  { %s475_s18 = smov 8  }
   0x3   :  { %23 = dma.hbm_to_vmem [thread:$0]  %s16_s14, 18432, %s18_s16, [#allocation3], %s474_s17, %s474_s17, %s475_s18  }
   0x4   :  { %471 = dma.done.wait [#allocation3], 18432  }
   0x5   :  { %472 = vsyncadd [#allocation3], 4294948864  ;;  %v47_v0 = vld [vmem:[#allocation2 + $0x78] sm:$0xff]  ;;  %v46_v1 = vld [vmem:[#allocation2 + $0x70] sm:$0xff]  ;;  %vm384_vm0 = vcmask 1043456   ;;  %vm380_vm1 = vcmask 162816  }
   0x6   :  { %196 = vmatpush.msra.mxu0 %v47_v0  ;;  %v79_v2 = vld [vmem:[#allocation2 + $0x178] sm:$0xff]  ;;  %v78_v3 = vld [vmem:[#allocation2 + $0x170] sm:$0xff]  ;;  %v45_v4 = vld [vmem:[#allocation2 + $0x68] sm:$0xff]  ;;  %vm427_vm5 = vcmask 24576  }
   0x7   :  { %236 = vmatpush.msra.mxu2 %v79_v2  ;;  %v95_v5 = vld [vmem:[#allocation2 + $0x1f8] sm:$0xff]  ;;  %v77_v7 = vld [vmem:[#allocation2 + $0x168] sm:$0xff]  ;;  %v94_v8 = vld [vmem:[#allocation2 + $0x1f0] sm:$0xff] }
   0x8   :  { %v63_v6 = vld [vmem:[#allocation2 + $0xf8] sm:$0xff]  ;;  %197 = vmatpush.msra.mxu0 %v46_v1  ;;  %256 = vmatpush.msra.mxu3 %v95_v5  ;;  %v44_v9 = vld [vmem:[#allocation2 + $0x60] sm:$0xff]  ;;  %v62_v10 = vld [vmem:[#allocation2 + $0xf0] sm:$0xff] }
   0x9   :  { %237 = vmatpush.msra.mxu2 %v78_v3  ;;  %216 = vmatpush.msra.mxu1 %v63_v6  ;;  %v93_v11 = vld [vmem:[#allocation2 + $0x1e8] sm:$0xff]  ;;  %v76_v12 = vld [vmem:[#allocation2 + $0x160] sm:$0xff]  ;;  %v43_v14 = vld [vmem:[#allocation2 + $0x58] sm:$0xff] }
   0xa   :  { %198 = vmatpush.msra.mxu0 %v45_v4  ;;  %257 = vmatpush.msra.mxu3 %v94_v8  ;;  %v61_v13 = vld [vmem:[#allocation2 + $0xe8] sm:$0xff]  ;;  %v92_v15 = vld [vmem:[#allocation2 + $0x1e0] sm:$0xff]  ;;  %v75_v16 = vld [vmem:[#allocation2 + $0x158] sm:$0xff] }
   0xb   :  { %238 = vmatpush.msra.mxu2 %v77_v7  ;;  %217 = vmatpush.msra.mxu1 %v62_v10  ;;  %v60_v17 = vld [vmem:[#allocation2 + $0xe0] sm:$0xff]  ;;  %v42_v18 = vld [vmem:[#allocation2 + $0x50] sm:$0xff]  ;;  %v91_v19 = vld [vmem:[#allocation2 + $0x1d8] sm:$0xff] }
   0xc   :  { %199 = vmatpush.msra.mxu0 %v44_v9  ;;  %258 = vmatpush.msra.mxu3 %v93_v11  ;;  %v74_v20 = vld [vmem:[#allocation2 + $0x150] sm:$0xff]  ;;  %v59_v21 = vld [vmem:[#allocation2 + $0xd8] sm:$0xff]  ;;  %v41_v22 = vld [vmem:[#allocation2 + $0x48] sm:$0xff] }
   0xd   :  { %239 = vmatpush.msra.mxu2 %v76_v12  ;;  %218 = vmatpush.msra.mxu1 %v61_v13  ;;  %v90_v23 = vld [vmem:[#allocation2 + $0x1d0] sm:$0xff]  ;;  %v73_v24 = vld [vmem:[#allocation2 + $0x148] sm:$0xff]  ;;  %v40_v26 = vld [vmem:[#allocation2 + $0x40] sm:$0xff] }
   0xe   :  { %200 = vmatpush.msra.mxu0 %v43_v14  ;;  %259 = vmatpush.msra.mxu3 %v92_v15  ;;  %v58_v25 = vld [vmem:[#allocation2 + $0xd0] sm:$0xff]  ;;  %v89_v27 = vld [vmem:[#allocation2 + $0x1c8] sm:$0xff]  ;;  %v72_v28 = vld [vmem:[#allocation2 + $0x140] sm:$0xff] }
   0xf   :  { %240 = vmatpush.msra.mxu2 %v75_v16  ;;  %219 = vmatpush.msra.mxu1 %v60_v17  ;;  %v57_v29 = vld [vmem:[#allocation2 + $0xc8] sm:$0xff]  ;;  %v39_v30 = vld [vmem:[#allocation2 + $0x38] sm:$0xff]  ;;  %v88_v31 = vld [vmem:[#allocation2 + $0x1c0] sm:$0xff] }
  0x10   :  { %201 = vmatpush.msra.mxu0 %v42_v18  ;;  %260 = vmatpush.msra.mxu3 %v91_v19  ;;  %v71_v32 = vld [vmem:[#allocation2 + $0x138] sm:$0xff]  ;;  %v56_v33 = vld [vmem:[#allocation2 + $0xc0] sm:$0xff]  ;;  %v38_v34 = vld [vmem:[#allocation2 + $0x30] sm:$0xff] }
  0x11   :  { %241 = vmatpush.msra.mxu2 %v74_v20  ;;  %220 = vmatpush.msra.mxu1 %v59_v21  ;;  %v87_v35 = vld [vmem:[#allocation2 + $0x1b8] sm:$0xff]  ;;  %v70_v36 = vld [vmem:[#allocation2 + $0x130] sm:$0xff]  ;;  %v37_v38 = vld [vmem:[#allocation2 + $0x28] sm:$0xff] }
  0x12   :  { %202 = vmatpush.msra.mxu0 %v41_v22  ;;  %261 = vmatpush.msra.mxu3 %v90_v23  ;;  %v55_v37 = vld [vmem:[#allocation2 + $0xb8] sm:$0xff]  ;;  %v86_v39 = vld [vmem:[#allocation2 + $0x1b0] sm:$0xff]  ;;  %v69_v40 = vld [vmem:[#allocation2 + $0x128] sm:$0xff] }
  0x13   :  { %242 = vmatpush.msra.mxu2 %v73_v24  ;;  %221 = vmatpush.msra.mxu1 %v58_v25  ;;  %v54_v41 = vld [vmem:[#allocation2 + $0xb0] sm:$0xff]  ;;  %v36_v42 = vld [vmem:[#allocation2 + $0x20] sm:$0xff]  ;;  %v85_v43 = vld [vmem:[#allocation2 + $0x1a8] sm:$0xff] }
  0x14   :  { %203 = vmatpush.msra.mxu0 %v40_v26  ;;  %262 = vmatpush.msra.mxu3 %v89_v27  ;;  %v68_v44 = vld [vmem:[#allocation2 + $0x120] sm:$0xff]  ;;  %v53_v45 = vld [vmem:[#allocation2 + $0xa8] sm:$0xff]  ;;  %v35_v46 = vld [vmem:[#allocation2 + $0x18] sm:$0xff] }
  0x15   :  { %243 = vmatpush.msra.mxu2 %v72_v28  ;;  %222 = vmatpush.msra.mxu1 %v57_v29  ;;  %v84_v47 = vld [vmem:[#allocation2 + $0x1a0] sm:$0xff]  ;;  %v67_v48 = vld [vmem:[#allocation2 + $0x118] sm:$0xff]  ;;  %v34_v50 = vld [vmem:[#allocation2 + $0x10] sm:$0xff] }
  0x16   :  { %204 = vmatpush.msra.mxu0 %v39_v30  ;;  %263 = vmatpush.msra.mxu3 %v88_v31  ;;  %v52_v49 = vld [vmem:[#allocation2 + $0xa0] sm:$0xff]  ;;  %v83_v51 = vld [vmem:[#allocation2 + $0x198] sm:$0xff]  ;;  %v66_v52 = vld [vmem:[#allocation2 + $0x110] sm:$0xff] }
  0x17   :  { %244 = vmatpush.msra.mxu2 %v71_v32  ;;  %223 = vmatpush.msra.mxu1 %v56_v33  ;;  %v51_v53 = vld [vmem:[#allocation2 + $0x98] sm:$0xff]  ;;  %v33_v54 = vld [vmem:[#allocation2 + $0x8] sm:$0xff]  ;;  %v82_v55 = vld [vmem:[#allocation2 + $0x190] sm:$0xff] }
  0x18   :  { %205 = vmatpush.msra.mxu0 %v38_v34  ;;  %264 = vmatpush.msra.mxu3 %v87_v35  ;;  %v65_v56 = vld [vmem:[#allocation2 + $0x108] sm:$0xff]  ;;  %v50_v57 = vld [vmem:[#allocation2 + $0x90] sm:$0xff]  ;;  %v32_v58 = vld [vmem:[#allocation2] sm:$0xff] }
  0x19   :  { %245 = vmatpush.msra.mxu2 %v70_v36  ;;  %224 = vmatpush.msra.mxu1 %v55_v37  ;;  %v81_v59 = vld [vmem:[#allocation2 + $0x188] sm:$0xff]  ;;  %v111_v60 = vld [vmem:[#allocation2 + $0x278] sm:$0xff]  ;;  %v64_v61 = vld [vmem:[#allocation2 + $0x100] sm:$0xff] }
  0x1a   :  { %206 = vmatpush.msra.mxu0 %v37_v38  ;;  %265 = vmatpush.msra.mxu3 %v86_v39  ;;  %v143_v62 = vld [vmem:[#allocation2 + $0x378] sm:$0xff]  ;;  %v49_v63 = vld [vmem:[#allocation2 + $0x88] sm:$0xff]  ;;  %v110_v0 = vld [vmem:[#allocation2 + $0x270] sm:$0xff] }
  0x1b   :  { %246 = vmatpush.msra.mxu2 %v69_v40  ;;  %225 = vmatpush.msra.mxu1 %v54_v41  ;;  %v80_v1 = vld [vmem:[#allocation2 + $0x180] sm:$0xff]  ;;  %v142_v2 = vld [vmem:[#allocation2 + $0x370] sm:$0xff]  ;;  %v159_v3 = vld [vmem:[#allocation2 + $0x3f8] sm:$0xff] }
  0x1c   :  { %207 = vmatpush.msra.mxu0 %v36_v42  ;;  %266 = vmatpush.msra.mxu3 %v85_v43  ;;  %v109_v4 = vld [vmem:[#allocation2 + $0x268] sm:$0xff]  ;;  %v48_v5 = vld [vmem:[#allocation2 + $0x80] sm:$0xff]  ;;  %v127_v6 = vld [vmem:[#allocation2 + $0x2f8] sm:$0xff] }
  0x1d   :  { %247 = vmatpush.msra.mxu2 %v68_v44  ;;  %226 = vmatpush.msra.mxu1 %v53_v45  ;;  %v141_v7 = vld [vmem:[#allocation2 + $0x368] sm:$0xff]  ;;  %v108_v8 = vld [vmem:[#allocation2 + $0x260] sm:$0xff]  ;;  %v158_v9 = vld [vmem:[#allocation2 + $0x3f0] sm:$0xff] }
  0x1e   :  { %208 = vmatpush.msra.mxu0 %v35_v46  ;;  %267 = vmatpush.msra.mxu3 %v84_v47  ;;  %v126_v10 = vld [vmem:[#allocation2 + $0x2f0] sm:$0xff]  ;;  %v140_v11 = vld [vmem:[#allocation2 + $0x360] sm:$0xff]  ;;  %v107_v12 = vld [vmem:[#allocation2 + $0x258] sm:$0xff] }
  0x1f   :  { %248 = vmatpush.msra.mxu2 %v67_v48  ;;  %227 = vmatpush.msra.mxu1 %v52_v49  ;;  %v157_v13 = vld [vmem:[#allocation2 + $0x3e8] sm:$0xff]  ;;  %v139_v15 = vld [vmem:[#allocation2 + $0x358] sm:$0xff]  ;;  %v106_v16 = vld [vmem:[#allocation2 + $0x250] sm:$0xff] }
  0x20   :  { %209 = vmatpush.msra.mxu0 %v34_v50  ;;  %268 = vmatpush.msra.mxu3 %v83_v51  ;;  %v125_v14 = vld [vmem:[#allocation2 + $0x2e8] sm:$0xff]  ;;  %v156_v17 = vld [vmem:[#allocation2 + $0x3e0] sm:$0xff]  ;;  %v138_v19 = vld [vmem:[#allocation2 + $0x350] sm:$0xff] }
  0x21   :  { %249 = vmatpush.msra.mxu2 %v66_v52  ;;  %228 = vmatpush.msra.mxu1 %v51_v53  ;;  %v124_v18 = vld [vmem:[#allocation2 + $0x2e0] sm:$0xff]  ;;  %v105_v20 = vld [vmem:[#allocation2 + $0x248] sm:$0xff]  ;;  %v155_v21 = vld [vmem:[#allocation2 + $0x3d8] sm:$0xff] }
  0x22   :  { %210 = vmatpush.msra.mxu0 %v33_v54  ;;  %269 = vmatpush.msra.mxu3 %v82_v55  ;;  %v123_v22 = vld [vmem:[#allocation2 + $0x2d8] sm:$0xff]  ;;  %v137_v23 = vld [vmem:[#allocation2 + $0x348] sm:$0xff]  ;;  %v104_v24 = vld [vmem:[#allocation2 + $0x240] sm:$0xff] }
  0x23   :  { %250 = vmatpush.msra.mxu2 %v65_v56  ;;  %229 = vmatpush.msra.mxu1 %v50_v57  ;;  %v154_v25 = vld [vmem:[#allocation2 + $0x3d0] sm:$0xff]  ;;  %v136_v27 = vld [vmem:[#allocation2 + $0x340] sm:$0xff]  ;;  %v103_v28 = vld [vmem:[#allocation2 + $0x238] sm:$0xff] }
  0x24   :  { %211 = vmatpush.msra.mxu0 %v32_v58  ;;  %270 = vmatpush.msra.mxu3 %v81_v59  ;;  %v122_v26 = vld [vmem:[#allocation2 + $0x2d0] sm:$0xff]  ;;  %v153_v29 = vld [vmem:[#allocation2 + $0x3c8] sm:$0xff]  ;;  %v135_v31 = vld [vmem:[#allocation2 + $0x338] sm:$0xff] }
  0x25   :  { %251 = vmatpush.msra.mxu2 %v64_v61  ;;  %230 = vmatpush.msra.mxu1 %v49_v63  ;;  %v121_v30 = vld [vmem:[#allocation2 + $0x2c8] sm:$0xff]  ;;  %v102_v32 = vld [vmem:[#allocation2 + $0x230] sm:$0xff]  ;;  %v152_v33 = vld [vmem:[#allocation2 + $0x3c0] sm:$0xff] }
  0x26   :  { %276 = vmatpush.msrb.mxu0 %v111_v60  ;;  %271 = vmatpush.msra.mxu3 %v80_v1  ;;  %v120_v34 = vld [vmem:[#allocation2 + $0x2c0] sm:$0xff]  ;;  %v134_v35 = vld [vmem:[#allocation2 + $0x330] sm:$0xff]  ;;  %v101_v36 = vld [vmem:[#allocation2 + $0x228] sm:$0xff] }
  0x27   :  { %316 = vmatpush.msrb.mxu2 %v143_v62  ;;  %231 = vmatpush.msra.mxu1 %v48_v5  ;;  %v151_v37 = vld [vmem:[#allocation2 + $0x3b8] sm:$0xff]  ;;  %v133_v39 = vld [vmem:[#allocation2 + $0x328] sm:$0xff]  ;;  %v502_v40 = vld [vmem:[%s527_s0] sm:$0xff] }
  0x28   :  { %277 = vmatpush.msrb.mxu0 %v110_v0  ;;  %336 = vmatpush.msrb.mxu3 %v159_v3  ;;  %v119_v38 = vld [vmem:[#allocation2 + $0x2b8] sm:$0xff]  ;;  %v100_v41 = vld [vmem:[#allocation2 + $0x220] sm:$0xff]  ;;  %v150_v42 = vld [vmem:[#allocation2 + $0x3b0] sm:$0xff]  ;;  %v180_v47 = vperm.slane %v502_v40, 2  ;;  %v178_v51 = vperm.slane %v502_v40, 0  ;;  %v181_v53 = vperm.slane %v502_v40, 3 }
  0x29   :  { %317 = vmatpush.msrb.mxu2 %v142_v2  ;;  %296 = vmatpush.msrb.mxu1 %v127_v6  ;;  %v118_v43 = vld [vmem:[#allocation2 + $0x2b0] sm:$0xff]  ;;  %v132_v44 = vld [vmem:[#allocation2 + $0x320] sm:$0xff]  ;;  %v99_v45 = vld [vmem:[#allocation2 + $0x218] sm:$0xff]  ;;  %v179_v59 = vperm.slane %v502_v40, 1  ;;  %v184_v3 = vperm.slane %v502_v40, 6 }
  0x2a   :  { %278 = vmatpush.msrb.mxu0 %v109_v4  ;;  %337 = vmatpush.msrb.mxu3 %v158_v9  ;;  %v149_v46 = vld [vmem:[#allocation2 + $0x3a8] sm:$0xff]  ;;  %v98_v49 = vld [vmem:[#allocation2 + $0x210] sm:$0xff]  ;;  %v131_v50 = vld [vmem:[#allocation2 + $0x318] sm:$0xff]  ;;  %v185_v9 = vperm.slane %v502_v40, 7 }
  0x2b   :  { %318 = vmatpush.msrb.mxu2 %v141_v7  ;;  %297 = vmatpush.msrb.mxu1 %v126_v10  ;;  %v117_v48 = vld [vmem:[#allocation2 + $0x2a8] sm:$0xff]  ;;  %v148_v52 = vld [vmem:[#allocation2 + $0x3a0] sm:$0xff]  ;;  %v130_v56 = vld [vmem:[#allocation2 + $0x310] sm:$0xff]  ;;  %v182_v7 = vperm.slane %v502_v40, 4 }
  0x2c   :  { %279 = vmatpush.msrb.mxu0 %v108_v8  ;;  %338 = vmatpush.msrb.mxu3 %v157_v13  ;;  %v97_v54 = vld [vmem:[#allocation2 + $0x208] sm:$0xff]  ;;  %v116_v55 = vld [vmem:[#allocation2 + $0x2a0] sm:$0xff]  ;;  %v147_v58 = vld [vmem:[#allocation2 + $0x398] sm:$0xff] }
  0x2d   :  { %319 = vmatpush.msrb.mxu2 %v140_v11  ;;  %298 = vmatpush.msrb.mxu1 %v125_v14  ;;  %v96_v57 = vld [vmem:[#allocation2 + $0x200] sm:$0xff]  ;;  %v175_v60 = vld [vmem:[#allocation2 + $0x478] sm:$0xff]  ;;  %v129_v62 = vld [vmem:[#allocation2 + $0x308] sm:$0xff] }
  0x2e   :  { %280 = vmatpush.msrb.mxu0 %v107_v12  ;;  %339 = vmatpush.msrb.mxu3 %v156_v17  ;;  %v115_v61 = vld [vmem:[#allocation2 + $0x298] sm:$0xff]  ;;  %v146_v63 = vld [vmem:[#allocation2 + $0x390] sm:$0xff]  ;;  %v128_v2 = vld [vmem:[#allocation2 + $0x300] sm:$0xff]  ;;  %v183_v12 = vperm.slane %v502_v40, 5 }
  0x2f   :  { %320 = vmatpush.msrb.mxu2 %v139_v15  ;;  %299 = vmatpush.msrb.mxu1 %v124_v18  ;;  %v174_v0 = vld [vmem:[#allocation2 + $0x470] sm:$0xff]  ;;  %v145_v4 = vld [vmem:[#allocation2 + $0x388] sm:$0xff]  ;;  %v144_v8 = vld [vmem:[#allocation2 + $0x380] sm:$0xff] }
  0x30   :  { %281 = vmatpush.msrb.mxu0 %v106_v16  ;;  %340 = vmatpush.msrb.mxu3 %v155_v21  ;;  %v114_v1 = vld [vmem:[#allocation2 + $0x290] sm:$0xff]  ;;  %v173_v5 = vld [vmem:[#allocation2 + $0x468] sm:$0xff]  ;;  %v172_v10 = vld [vmem:[#allocation2 + $0x460] sm:$0xff] }
  0x31   :  { %321 = vmatpush.msrb.mxu2 %v138_v19  ;;  %300 = vmatpush.msrb.mxu1 %v123_v22  ;;  %v113_v6 = vld [vmem:[#allocation2 + $0x288] sm:$0xff]  ;;  %v112_v11 = vld [vmem:[#allocation2 + $0x280] sm:$0xff]  ;;  %v171_v13 = vld [vmem:[#allocation2 + $0x458] sm:$0xff] }
  0x32   :  { %282 = vmatpush.msrb.mxu0 %v105_v20  ;;  %341 = vmatpush.msrb.mxu3 %v154_v25  ;;  %v170_v14 = vld [vmem:[#allocation2 + $0x450] sm:$0xff]  ;;  %v169_v15 = vld [vmem:[#allocation2 + $0x448] sm:$0xff]  ;;  %v168_v16 = vld [vmem:[#allocation2 + $0x440] sm:$0xff] }
  0x33   :  { %322 = vmatpush.msrb.mxu2 %v137_v23  ;;  %301 = vmatpush.msrb.mxu1 %v122_v26  ;;  %v167_v17 = vld [vmem:[#allocation2 + $0x438] sm:$0xff]  ;;  %v166_v18 = vld [vmem:[#allocation2 + $0x430] sm:$0xff]  ;;  %v165_v19 = vld [vmem:[#allocation2 + $0x428] sm:$0xff] }
  0x34   :  { %283 = vmatpush.msrb.mxu0 %v104_v24  ;;  %342 = vmatpush.msrb.mxu3 %v153_v29  ;;  %v164_v20 = vld [vmem:[#allocation2 + $0x420] sm:$0xff]  ;;  %v163_v21 = vld [vmem:[#allocation2 + $0x418] sm:$0xff]  ;;  %v162_v22 = vld [vmem:[#allocation2 + $0x410] sm:$0xff] }
  0x35   :  { %323 = vmatpush.msrb.mxu2 %v136_v27  ;;  %302 = vmatpush.msrb.mxu1 %v121_v30  ;;  %v161_v23 = vld [vmem:[#allocation2 + $0x408] sm:$0xff]  ;;  %v160_v24 = vld [vmem:[#allocation2 + $0x400] sm:$0xff]  ;;  %v379_v26 = vld [vmem:[%s529_s2 + $0x10] sm:$0xf] }
  0x36   :  { %284 = vmatpush.msrb.mxu0 %v103_v28  ;;  %343 = vmatpush.msrb.mxu3 %v152_v33  ;;  %v440_v25 = vld [vmem:[%s527_s0 + $0x8] ss:$0 sm:$0xff]  ;;  %v377_v29 = vld [vmem:[%s529_s2] sm:$0xff] }
  0x37   :  { %324 = vmatpush.msrb.mxu2 %v135_v31  ;;  %303 = vmatpush.msrb.mxu1 %v120_v34  ;;  %v378_v27 = vld [vmem:[%s529_s2 + $0x8] sm:$0xff] }
  0x38   :  { %285 = vmatpush.msrb.mxu0 %v102_v32  ;;  %344 = vmatpush.msrb.mxu3 %v151_v37 }
  0x39   :  { %325 = vmatpush.msrb.mxu2 %v134_v35  ;;  %304 = vmatpush.msrb.mxu1 %v119_v38 }
  0x3a   :  { %286 = vmatpush.msrb.mxu0 %v101_v36  ;;  %345 = vmatpush.msrb.mxu3 %v150_v42 }
  0x3b   :  { %326 = vmatpush.msrb.mxu2 %v133_v39  ;;  %305 = vmatpush.msrb.mxu1 %v118_v43 }
  0x3c   :  { %287 = vmatpush.msrb.mxu0 %v100_v41  ;;  %346 = vmatpush.msrb.mxu3 %v149_v46 }
  0x3d   :  { %327 = vmatpush.msrb.mxu2 %v132_v44  ;;  %306 = vmatpush.msrb.mxu1 %v117_v48 }
  0x3e   :  { %288 = vmatpush.msrb.mxu0 %v99_v45  ;;  %252 = vmatmul.f32.vlgmr.msra.gmra.mxu2 %v180_v47 }
  0x3f   :  { %328 = vmatpush.msrb.mxu2 %v131_v50  ;;  %347 = vmatpush.msrb.mxu3 %v148_v52 }
  0x40   :  { %289 = vmatpush.msrb.mxu0 %v98_v49  ;;  %272 = vmatmul.f32.vlgmr.msra.gmra.mxu3 %v181_v53 }
  0x41   :  { %212 = vmatmul.f32.vlgmr.msra.gmra.mxu0 %v178_v51  ;;  %307 = vmatpush.msrb.mxu1 %v116_v55 }
  0x42   :  { %290 = vmatpush.msrb.mxu0 %v97_v54  ;;  %329 = vmatpush.msrb.mxu2 %v130_v56 }
  0x43   :  { %348 = vmatpush.msrb.mxu3 %v147_v58  ;;  %232 = vmatmul.f32.vlgmr.msra.gmra.mxu1 %v179_v59 }
  0x44   :  { %291 = vmatpush.msrb.mxu0 %v96_v57  ;;  %308 = vmatpush.msrb.mxu1 %v115_v61 }
  0x45   :  { %330 = vmatpush.msrb.mxu2 %v129_v62  ;;  %349 = vmatpush.msrb.mxu3 %v146_v63 }
  0x46   :  { %356 = vmatpush.msra.mxu0 %v175_v60  ;;  %309 = vmatpush.msrb.mxu1 %v114_v1 }
  0x47   :  { %331 = vmatpush.msrb.mxu2 %v128_v2  ;;  %350 = vmatpush.msrb.mxu3 %v145_v4 }
  0x48   :  { %357 = vmatpush.msra.mxu0 %v174_v0  ;;  %332 = vmatmul.f32.vlgmr.msrb.gmra.mxu2 %v184_v3 }
  0x49   :  { %310 = vmatpush.msrb.mxu1 %v113_v6  ;;  %351 = vmatpush.msrb.mxu3 %v144_v8 }
  0x4a   :  { %358 = vmatpush.msra.mxu0 %v173_v5  ;;  %352 = vmatmul.f32.vlgmr.msrb.gmra.mxu3 %v185_v9 }
  0x4b   :  { %292 = vmatmul.f32.vlgmr.msrb.gmra.mxu0 %v182_v7  ;;  %311 = vmatpush.msrb.mxu1 %v112_v11 }
  0x4c   :  { %359 = vmatpush.msra.mxu0 %v172_v10  ;;  %312 = vmatmul.f32.vlgmr.msrb.gmra.mxu1 %v183_v12 }
  0x4d   :  { %434 = vmatpush.msk.msra.mxu1 %vm384_vm0, %v379_v26 }
  0x4e   :  { %360 = vmatpush.msra.mxu0 %v171_v13 }
  0x4f   :  { %402 = vmatpush.msra.mxu1 %v378_v27 }
  0x50   :  { %361 = vmatpush.msra.mxu0 %v170_v14 }
  0x51   :  { %403 = vmatpush.msra.mxu1 %v377_v29 }
  0x52   :  { %362 = vmatpush.msra.mxu0 %v169_v15 }
  0x54   :  { %363 = vmatpush.msra.mxu0 %v168_v16 }
  0x56   :  { %364 = vmatpush.msra.mxu0 %v167_v17 }
  0x58   :  { %365 = vmatpush.msra.mxu0 %v166_v18 }
  0x5a   :  { %366 = vmatpush.msra.mxu0 %v165_v19 }
  0x5c   :  { %367 = vmatpush.msra.mxu0 %v164_v20 }
  0x5e   :  { %368 = vmatpush.msra.mxu0 %v163_v21 }
  0x60   :  { %369 = vmatpush.msra.mxu0 %v162_v22 }
  0x62   :  { %370 = vmatpush.msra.mxu0 %v161_v23 }
  0x64   :  { %371 = vmatpush.msra.mxu0 %v160_v24 }
  0x65   :  { %372 = vmatmul.f32.vlgmr.msra.gmra.mxu0 %v440_v25 }
  0xbe   :  { %v213_v30 = vpop.f32.mrf.mxu0 }
  0xc0   :  { %v233_v28 = vpop.f32.mrf.mxu1 }
  0xc1   :  { %v234_v31 = vadd.f32 %v233_v28, %v213_v30  ;;  %v253_v32 = vpop.f32.mrf.mxu2 }
  0xc3   :  { %v254_v33 = vadd.f32 %v253_v32, %v234_v31  ;;  %v273_v34 = vpop.f32.mrf.mxu3 }
  0xc5   :  { %v274_v35 = vadd.f32 %v273_v34, %v254_v33 }
  0xc8   :  { %v293_v36 = vpop.f32.mrf.mxu0 }
  0xc9   :  { %v294_v37 = vadd.f32 %v293_v36, %v274_v35  ;;  %v313_v38 = vpop.f32.mrf.mxu1 }
  0xcb   :  { %v314_v39 = vadd.f32 %v313_v38, %v294_v37  ;;  %v333_v40 = vpop.f32.mrf.mxu2 }
  0xcd   :  { %v334_v41 = vadd.f32 %v333_v40, %v314_v39  ;;  %v353_v42 = vpop.f32.mrf.mxu3 }
  0xcf   :  { %v354_v43 = vadd.f32 %v353_v42, %v334_v41 }
  0xe2   :  { %v373_v44 = vpop.f32.mrf.mxu0 }
  0xe3   :  { %v374_v45 = vadd.f32 %v373_v44, %v354_v43 }
  0xe5   :  { %441 = vtanh.f32 %v374_v45 }
  0xeb   :  { %v442_v46 = vpop.eup %441 }
  0xec   :  { %435 = vmatmul.msk.f32.vlgmr.msra.gmra.mxu1 %vm380_vm1, %v442_v46 }
 0x169   :  { %v405_v47 = vpop.f32.mrf.mxu1 }
 0x16a   :  { %v436_v48 = vmul.f32 -1.442695, %v405_v47 }
 0x16c   :  { %443 = vpow2.f32 %v436_v48 }
 0x172   :  { %v444_v49 = vpop.eup %443 }
 0x173   :  { %v411_v50 = vadd.f32 1.0, %v444_v49 }
 0x175   :  { %445 = vrcp.f32 %v411_v50  ;;  %v423_v54 = vand.u32 2147483648, %v411_v50  ;;  %v421_v56 = vand.u32 2147483647, %v411_v50  ;;  %vm417_vm3 = vweird.f32 %v411_v50 }
 0x177   :  { %v424_v58 = vor.u32 1.1754944e-38, %v423_v54  ;;  %vm422_vm6 = vcmp.eq.f32.partialorder %v421_v56, 8.507059e+37 }
 0x17b   :  { %v446_v51 = vpop.eup %445 }
 0x17c   :  { %v413_v52 = vmul.f32 %v446_v51, %v411_v50  ;;  %vm418_vm2 = vweird.f32 %v446_v51 }
 0x17d   :  { %vm419_vm4 = vmor %vm417_vm3, %vm418_vm2 }
 0x17e   :  { %v414_v53 = vsub.f32 1.0, %v413_v52 }
 0x180   :  { %v415_v55 = vmul.f32 %v446_v51, %v414_v53 }
 0x182   :  { %v416_v57 = vadd.f32 %v446_v51, %v415_v55 }
 0x184   :  { %v420_v59 = vsel %vm419_vm4, %v446_v51, %v416_v57 }
 0x185   :  { %v425_v60 = vsel %vm422_vm6, %v424_v58, %v420_v59 }
 0x186   :  { %428 = vst.msk [vmem:[%s530_s3] sm:$0x1] %vm427_vm5, %v425_v60 }
 0x187   :  { %433 = vsyncpa [#allocation3], 1 }

</bundles_post_ra>
